<compile_context>
chip_gen: v5e
topology: v5e:2x2
jax: 0.10.0
libtpu: 0.0.40
codegen_flags: <defaults>
</compile_context>

<pallas_src>
import functools

import jax
import jax.numpy as jnp
from jax.experimental import pallas as pl
from jax.experimental.pallas import tpu as pltpu


# ----------------------------------------------------------------------------
# Pallas kernels
# ----------------------------------------------------------------------------
def _encoder_kernel(taps_ref, w_ref, b_ref, scale_ref, shift_ref, o_ref):
    """Fused conv-matmul + bias + ReLU + 2x2 max-pool + folded BatchNorm.

    taps_ref : (4, TM, K) bf16 -- im2col patches for the 4 taps of every 2x2
               pooling window; rows ordered (b, hp, wp).
    w_ref    : (K, C)  bf16    -- conv weight, rows ordered (cin, kh, kw).
    b_ref, scale_ref, shift_ref : (1, C) f32.
    o_ref    : (TM, C)         -- pooled + BN'd activation (NHWC rows), bf16.
    """
    w = w_ref[...]
    m = jnp.dot(taps_ref[0], w, preferred_element_type=jnp.float32)
    m = jnp.maximum(m, jnp.dot(taps_ref[1], w, preferred_element_type=jnp.float32))
    m = jnp.maximum(m, jnp.dot(taps_ref[2], w, preferred_element_type=jnp.float32))
    m = jnp.maximum(m, jnp.dot(taps_ref[3], w, preferred_element_type=jnp.float32))
    # pool(relu(conv + b)) == relu(max_tap(conv) + b): bias is tap-independent
    # and ReLU is monotone, so the max can be taken before bias/ReLU.
    a = jnp.maximum(m + b_ref[...], 0.0)
    o_ref[...] = (a * scale_ref[...] + shift_ref[...]).astype(o_ref.dtype)


def _head_kernel(x_ref, w1_ref, b1_ref, w2_ref, b2_ref, o_ref):
    """logits = relu(x @ W1 + b1) @ W2 + b2 (fc1+ReLU+fc2 fused)."""
    h = jnp.dot(x_ref[...], w1_ref[...], preferred_element_type=jnp.float32)
    h = jnp.maximum(h + b1_ref[...], 0.0)
    # TODO(synk): Dropout(0.1) is identity under eval semantics; training-mode
    # stochastic masking is intentionally not reproduced.
    out = jnp.dot(h.astype(w2_ref.dtype), w2_ref[...],
                  preferred_element_type=jnp.float32)
    o_ref[...] = out + b2_ref[...]


_VMEM = pl.BlockSpec(memory_space=pltpu.MemorySpace.VMEM)
_ENC_TILE_M = 512               # rows per grid step once M outgrows one block
_VMEM_LIMIT = 32 * 1024 * 1024  # safe on v5e / v6e / v7x


# ----------------------------------------------------------------------------
# Wrappers
# ----------------------------------------------------------------------------
def encoder_block(taps, w, b, scale, shift, *, out_dtype=jnp.bfloat16):
    """One fused encoder: (4, M, K) taps -> (M, C) pooled/BN'd activation."""
    _, M, K = taps.shape
    C = w.shape[1]
    tm = M if M <= _ENC_TILE_M else _ENC_TILE_M
    grid = (pl.cdiv(M, tm),)
    return pl.pallas_call(
        _encoder_kernel,
        out_shape=jax.ShapeDtypeStruct((M, C), out_dtype),
        grid=grid,
        in_specs=[
            pl.BlockSpec((4, tm, K), lambda i: (0, i, 0)),
            pl.BlockSpec((K, C), lambda i: (0, 0)),
            pl.BlockSpec((1, C), lambda i: (0, 0)),
            pl.BlockSpec((1, C), lambda i: (0, 0)),
            pl.BlockSpec((1, C), lambda i: (0, 0)),
        ],
        out_specs=pl.BlockSpec((tm, C), lambda i: (i, 0)),
        compiler_params=pltpu.CompilerParams(
            dimension_semantics=("parallel",),
            vmem_limit_bytes=_VMEM_LIMIT,
        ),
    )(taps, w, b, scale, shift)


def mlp_head(x, w1, b1, w2, b2):
    B = x.shape[0]
    N = w2.shape[1]
    return pl.pallas_call(
        _head_kernel,
        out_shape=jax.ShapeDtypeStruct((B, N), jnp.float32),
        in_specs=[_VMEM] * 5,
        out_specs=_VMEM,
        compiler_params=pltpu.CompilerParams(vmem_limit_bytes=_VMEM_LIMIT),
    )(x, w1, b1, w2, b2)


def _pool_taps(patches, hp, wp):
    """(B, Ho, Wo, K) conv patches -> (4, B*hp*wp, K) bf16 pooling-tap stack.

    Static strided slices + stack (no gather).  Floor-mode 2x2 pooling: rows /
    cols beyond 2*hp / 2*wp are dropped, matching PyTorch MaxPool2d(2).
    """
    B, _, _, K = patches.shape
    taps = [patches[:, dh:2 * hp:2, dw:2 * wp:2, :]
            for dh in (0, 1) for dw in (0, 1)]
    taps = jnp.stack(taps, axis=0).reshape(4, B * hp * wp, K)
    return taps.astype(jnp.bfloat16)


# ----------------------------------------------------------------------------
# Parameters
# ----------------------------------------------------------------------------
def init_params(key, num_labels, num_maps1, num_maps2, num_hidden_input, hidden_size):
    ks = jax.random.split(key, 10)
    f32 = jnp.float32

    def bn_params(k, c):
        k1, k2, k3, k4 = jax.random.split(k, 4)
        gamma = 1.0 + 0.1 * jax.random.normal(k1, (c,), f32)
        beta = 0.1 * jax.random.normal(k2, (c,), f32)
        mean = 0.1 * jax.random.normal(k3, (c,), f32)
        var = 1.0 + 0.1 * jax.random.uniform(k4, (c,), f32)
        eps = 1e-5
        scale = gamma / jnp.sqrt(var + eps)     # eval-mode fold
        shift = beta - mean * scale
        return scale, shift

    p = {
        "conv0_w": 0.1 * jax.random.normal(ks[0], (num_maps1, 1, 8, 16), f32),
        "conv0_b": 0.1 * jax.random.normal(ks[1], (num_maps1,), f32),
        "conv1_w": 0.1 * jax.random.normal(ks[2], (num_maps2, num_maps1, 5, 5), f32),
        "conv1_b": 0.1 * jax.random.normal(ks[3], (num_maps2,), f32),
        "fc1_w": 0.1 * jax.random.normal(ks[4], (num_hidden_input, hidden_size), f32),
        "fc1_b": 0.1 * jax.random.normal(ks[5], (hidden_size,), f32),
        "fc2_w": 0.1 * jax.random.normal(ks[6], (hidden_size, num_labels), f32),
        "fc2_b": 0.1 * jax.random.normal(ks[7], (num_labels,), f32),
    }
    p["bn1_scale"], p["bn1_shift"] = bn_params(ks[8], num_maps1)
    p["bn2_scale"], p["bn2_shift"] = bn_params(ks[9], num_maps2)
    return p


def prepare_params(params, input_hw, num_hidden_input):
    """One-time weight preprocessing (reshape / permute / bf16 cast)."""
    H, W = input_hw
    C1 = params["conv0_w"].shape[0]
    C2 = params["conv1_w"].shape[0]
    hidden = params["fc1_w"].shape[1]

    # Static shape inference (matches the PyTorch conv/pool hyper-params).
    H1 = (H + 2 * 4 - 8) // 2 + 1
    W1 = (W + 2 * 0 - 16) // 2 + 1
    Hp1, Wp1 = H1 // 2, W1 // 2
    H2 = (Hp1 + 2 * 2 - 5) // 2 + 1
    W2 = (Wp1 + 2 * 2 - 5) // 1 + 1
    Hp2, Wp2 = H2 // 2, W2 // 2
    # x2.view(-1, num_hidden_input): we only support the per-sample-flatten case.
    assert C2 * Hp2 * Wp2 == num_hidden_input, (C2, Hp2, Wp2, num_hidden_input)

    bf16 = jnp.bfloat16
    # Fold the NCHW->flatten permutation into fc1's rows so the NHWC-contiguous
    # kernel output can be fed to the head with a free reshape (no transpose).
    fc1_w = params["fc1_w"].reshape(C2, Hp2, Wp2, hidden)
    fc1_w = fc1_w.transpose(1, 2, 0, 3).reshape(num_hidden_input, hidden)

    prep = {
        "w1": params["conv0_w"].reshape(C1, -1).T.astype(bf16),      # (128, C1)
        "b1": params["conv0_b"].reshape(1, C1),
        "sc1": params["bn1_scale"].reshape(1, C1),
        "sh1": params["bn1_shift"].reshape(1, C1),
        "w2": params["conv1_w"].reshape(C2, -1).T.astype(bf16),      # (C1*25, C2)
        "b2": params["conv1_b"].reshape(1, C2),
        "sc2": params["bn2_scale"].reshape(1, C2),
        "sh2": params["bn2_shift"].reshape(1, C2),
        "fc1_w": fc1_w.astype(bf16),
        "fc1_b": params["fc1_b"].reshape(1, -1),
        "fc2_w": params["fc2_w"].astype(bf16),
        "fc2_b": params["fc2_b"].reshape(1, -1),
    }
    cfg = dict(C1=C1, C2=C2, Hp1=Hp1, Wp1=Wp1, Hp2=Hp2, Wp2=Wp2,
               num_hidden_input=num_hidden_input)
    return prep, cfg


# ----------------------------------------------------------------------------
# Forward pass
# ----------------------------------------------------------------------------
def cnn_forward(prep, x, *, cfg):
    B = x.shape[0]

    # encoder1: conv0 (k=(8,16), pad=(4,0), stride=(2,2)) -> ReLU -> pool -> BN
    # Cast to bf16 up-front: the patch extraction is an identity copy, so this
    # is numerically identical to casting the taps later, at half the HBM bytes.
    xb = x.astype(jnp.bfloat16)
    p1 = jax.lax.conv_general_dilated_patches(
        xb, filter_shape=(8, 16), window_strides=(2, 2),
        padding=((4, 4), (0, 0)),
        dimension_numbers=("NCHW", "OIHW", "NHWC"))          # (B, Ho1, Wo1, 128)
    t1 = _pool_taps(p1, cfg["Hp1"], cfg["Wp1"])              # (4, B*Hp1*Wp1, 128)
    y1 = encoder_block(t1, prep["w1"], prep["b1"], prep["sc1"], prep["sh1"])
    y1 = y1.reshape(B, cfg["Hp1"], cfg["Wp1"], cfg["C1"])    # free reshape (NHWC)

    # encoder2: conv1 (k=(5,5), pad=(2,2), stride=(2,1)) -> ReLU -> pool -> BN
    p2 = jax.lax.conv_general_dilated_patches(
        y1, filter_shape=(5, 5), window_strides=(2, 1),
        padding=((2, 2), (2, 2)),
        dimension_numbers=("NHWC", "HWIO", "NHWC"))          # (B, Ho2, Wo2, C1*25)
    t2 = _pool_taps(p2, cfg["Hp2"], cfg["Wp2"])              # (4, B*Hp2*Wp2, C1*25)
    y2 = encoder_block(t2, prep["w2"], prep["b2"], prep["sc2"], prep["sh2"])

    # Flatten: NHWC-contiguous reshape (free, already bf16); the NCHW view
    # ordering of the original model is folded into fc1's pre-permuted rows.
    flat = y2.reshape(B, cfg["num_hidden_input"])

    # output head: Linear -> ReLU -> Dropout(0.1)[eval: identity] -> Linear
    return mlp_head(flat, prep["fc1_w"], prep["fc1_b"], prep["fc2_w"], prep["fc2_b"])


# ----------------------------------------------------------------------------
if __name__ == "__main__":
    # Shapes consistent with the module:
    #   input (B=2, 1, H=40, W=48)
    #   conv0 -> (2, 4, 21, 17) ; pool -> (2, 4, 10, 8)
    #   conv1 -> (2, 8, 5, 8)   ; pool -> (2, 8, 2, 4)  -> flatten 64
    num_labels, num_maps1, num_maps2 = 4, 4, 8
    num_hidden_input, hidden_size = 64, 32
    B, H, W = 2, 40, 48

    key = jax.random.PRNGKey(0)
    k_params, k_x = jax.random.split(key)
    params = init_params(k_params, num_labels, num_maps1, num_maps2,
                         num_hidden_input, hidden_size)
    prep, cfg = prepare_params(params, (H, W), num_hidden_input)
    x = jax.random.normal(k_x, (B, 1, H, W), jnp.float32)

    fwd = jax.jit(functools.partial(cnn_forward, cfg=cfg))
    out = fwd(prep, x)
    jax.block_until_ready(out)

    assert out.shape == (B, num_labels), out.shape
    assert out.dtype == jnp.float32
    print("KERNEL_OK")
</pallas_src>

<mosaic_0001>
module attributes {stable_mosaic.version = 11 : i64} {
  func.func @_encoder_kernel(%arg0: i32, %arg1: memref<4x160x128xbf16, #tpu.memory_space<vmem>>, %arg2: memref<128x4xbf16, #tpu.memory_space<vmem>>, %arg3: memref<1x4xf32, #tpu.memory_space<vmem>>, %arg4: memref<1x4xf32, #tpu.memory_space<vmem>>, %arg5: memref<1x4xf32, #tpu.memory_space<vmem>>, %arg6: memref<160x4xbf16, #tpu.memory_space<vmem>>) attributes {dimension_semantics = [#tpu.dimension_semantics<parallel>], iteration_bounds = array<i64: 1>, scalar_prefetch = 0 : i64, scratch_operands = 0 : i64, tpu.core_type = #tpu.core_type<tc>, window_params = [{transform_indices = @transform_0, window_bounds = array<i64: 4, 160, 128>}, {pipeline_mode = #tpu.pipeline_mode<synchronous>, transform_indices = @transform_1, window_bounds = array<i64: 128, 4>}, {pipeline_mode = #tpu.pipeline_mode<synchronous>, transform_indices = @transform_2, window_bounds = array<i64: 1, 4>}, {pipeline_mode = #tpu.pipeline_mode<synchronous>, transform_indices = @transform_3, window_bounds = array<i64: 1, 4>}, {pipeline_mode = #tpu.pipeline_mode<synchronous>, transform_indices = @transform_4, window_bounds = array<i64: 1, 4>}, {transform_indices = @transform_5, window_bounds = array<i64: 160, 4>}]} {
    %c0 = arith.constant 0 : index
    %c0_0 = arith.constant 0 : index
    %0 = vector.load %arg2[%c0, %c0_0] : memref<128x4xbf16, #tpu.memory_space<vmem>>, vector<128x4xbf16>
    %c0_1 = arith.constant 0 : index
    %c0_2 = arith.constant 0 : index
    %c0_3 = arith.constant 0 : index
    %1 = vector.load %arg1[%c0_1, %c0_2, %c0_3] : memref<4x160x128xbf16, #tpu.memory_space<vmem>>, vector<1x160x128xbf16>
    %2 = vector.shape_cast %1 : vector<1x160x128xbf16> to vector<160x128xbf16>
    %cst = arith.constant dense<0.000000e+00> : vector<160x4xf32>
    %3 = tpu.matmul %2, %0, %cst {dimension_numbers = #tpu.dot_dimension_numbers<[1], [0], [0], [1], [0, 0, 1, 1], [], []>} : vector<160x128xbf16>, vector<128x4xbf16>, vector<160x4xf32> -> vector<160x4xf32>
    %c1 = arith.constant 1 : index
    %c0_4 = arith.constant 0 : index
    %c0_5 = arith.constant 0 : index
    %4 = vector.load %arg1[%c1, %c0_4, %c0_5] : memref<4x160x128xbf16, #tpu.memory_space<vmem>>, vector<1x160x128xbf16>
    %5 = vector.shape_cast %4 : vector<1x160x128xbf16> to vector<160x128xbf16>
    %cst_6 = arith.constant dense<0.000000e+00> : vector<160x4xf32>
    %6 = tpu.matmul %5, %0, %cst_6 {dimension_numbers = #tpu.dot_dimension_numbers<[1], [0], [0], [1], [0, 0, 1, 1], [], []>} : vector<160x128xbf16>, vector<128x4xbf16>, vector<160x4xf32> -> vector<160x4xf32>
    %7 = arith.maximumf %3, %6 : vector<160x4xf32>
    %c2 = arith.constant 2 : index
    %c0_7 = arith.constant 0 : index
    %c0_8 = arith.constant 0 : index
    %8 = vector.load %arg1[%c2, %c0_7, %c0_8] : memref<4x160x128xbf16, #tpu.memory_space<vmem>>, vector<1x160x128xbf16>
    %9 = vector.shape_cast %8 : vector<1x160x128xbf16> to vector<160x128xbf16>
    %cst_9 = arith.constant dense<0.000000e+00> : vector<160x4xf32>
    %10 = tpu.matmul %9, %0, %cst_9 {dimension_numbers = #tpu.dot_dimension_numbers<[1], [0], [0], [1], [0, 0, 1, 1], [], []>} : vector<160x128xbf16>, vector<128x4xbf16>, vector<160x4xf32> -> vector<160x4xf32>
    %11 = arith.maximumf %7, %10 : vector<160x4xf32>
    %c3 = arith.constant 3 : index
    %c0_10 = arith.constant 0 : index
    %c0_11 = arith.constant 0 : index
    %12 = vector.load %arg1[%c3, %c0_10, %c0_11] : memref<4x160x128xbf16, #tpu.memory_space<vmem>>, vector<1x160x128xbf16>
    %13 = vector.shape_cast %12 : vector<1x160x128xbf16> to vector<160x128xbf16>
    %cst_12 = arith.constant dense<0.000000e+00> : vector<160x4xf32>
    %14 = tpu.matmul %13, %0, %cst_12 {dimension_numbers = #tpu.dot_dimension_numbers<[1], [0], [0], [1], [0, 0, 1, 1], [], []>} : vector<160x128xbf16>, vector<128x4xbf16>, vector<160x4xf32> -> vector<160x4xf32>
    %15 = arith.maximumf %11, %14 : vector<160x4xf32>
    %c0_13 = arith.constant 0 : index
    %c0_14 = arith.constant 0 : index
    %16 = vector.load %arg3[%c0_13, %c0_14] : memref<1x4xf32, #tpu.memory_space<vmem>>, vector<1x4xf32>
    %17 = vector.broadcast %16 : vector<1x4xf32> to vector<160x4xf32>
    %18 = arith.addf %15, %17 : vector<160x4xf32>
    %cst_15 = arith.constant 0.000000e+00 : f32
    %19 = vector.broadcast %cst_15 : f32 to vector<160x4xf32>
    %20 = arith.maximumf %18, %19 : vector<160x4xf32>
    %c0_16 = arith.constant 0 : index
    %c0_17 = arith.constant 0 : index
    %21 = vector.load %arg4[%c0_16, %c0_17] : memref<1x4xf32, #tpu.memory_space<vmem>>, vector<1x4xf32>
    %22 = vector.broadcast %21 : vector<1x4xf32> to vector<160x4xf32>
    %23 = arith.mulf %20, %22 : vector<160x4xf32>
    %c0_18 = arith.constant 0 : index
    %c0_19 = arith.constant 0 : index
    %24 = vector.load %arg5[%c0_18, %c0_19] : memref<1x4xf32, #tpu.memory_space<vmem>>, vector<1x4xf32>
    %25 = vector.broadcast %24 : vector<1x4xf32> to vector<160x4xf32>
    %26 = arith.addf %23, %25 : vector<160x4xf32>
    %27 = arith.truncf %26 : vector<160x4xf32> to vector<160x4xbf16>
    %c0_20 = arith.constant 0 : index
    %c0_21 = arith.constant 0 : index
    %28 = vector.load %arg6[%c0_20, %c0_21] : memref<160x4xbf16, #tpu.memory_space<vmem>>, vector<160x4xbf16>
    tpu.vector_store %arg6[%c0_20, %c0_21], %27 {strides = array<i32>} : memref<160x4xbf16, #tpu.memory_space<vmem>>, vector<160x4xbf16>,
    return
  }
  func.func @transform_0(%arg0: i32) -> (i32, i32, i32) {
    %c0_i32 = arith.constant 0 : i32
    %c0_i32_0 = arith.constant 0 : i32
    %c0_i32_1 = arith.constant 0 : i32
    return %c0_i32, %arg0, %c0_i32_0 : i32, i32, i32
  }
  func.func @transform_1(%arg0: i32) -> (i32, i32) {
    %c0_i32 = arith.constant 0 : i32
    %c0_i32_0 = arith.constant 0 : i32
    %c0_i32_1 = arith.constant 0 : i32
    return %c0_i32, %c0_i32_0 : i32, i32
  }
  func.func @transform_2(%arg0: i32) -> (i32, i32) {
    %c0_i32 = arith.constant 0 : i32
    %c0_i32_0 = arith.constant 0 : i32
    %c0_i32_1 = arith.constant 0 : i32
    return %c0_i32, %c0_i32_0 : i32, i32
  }
  func.func @transform_3(%arg0: i32) -> (i32, i32) {
    %c0_i32 = arith.constant 0 : i32
    %c0_i32_0 = arith.constant 0 : i32
    %c0_i32_1 = arith.constant 0 : i32
    return %c0_i32, %c0_i32_0 : i32, i32
  }
  func.func @transform_4(%arg0: i32) -> (i32, i32) {
    %c0_i32 = arith.constant 0 : i32
    %c0_i32_0 = arith.constant 0 : i32
    %c0_i32_1 = arith.constant 0 : i32
    return %c0_i32, %c0_i32_0 : i32, i32
  }
  func.func @transform_5(%arg0: i32) -> (i32, i32) {
    %c0_i32 = arith.constant 0 : i32
    %c0_i32_0 = arith.constant 0 : i32
    return %arg0, %c0_i32 : i32, i32
  }
}

module attributes {stable_mosaic.version = 11 : i64} {
  func.func @_encoder_kernel(%arg0: i32, %arg1: memref<4x16x100xbf16, #tpu.memory_space<vmem>>, %arg2: memref<100x8xbf16, #tpu.memory_space<vmem>>, %arg3: memref<1x8xf32, #tpu.memory_space<vmem>>, %arg4: memref<1x8xf32, #tpu.memory_space<vmem>>, %arg5: memref<1x8xf32, #tpu.memory_space<vmem>>, %arg6: memref<16x8xbf16, #tpu.memory_space<vmem>>) attributes {dimension_semantics = [#tpu.dimension_semantics<parallel>], iteration_bounds = array<i64: 1>, scalar_prefetch = 0 : i64, scratch_operands = 0 : i64, tpu.core_type = #tpu.core_type<tc>, window_params = [{transform_indices = @transform_0, window_bounds = array<i64: 4, 16, 100>}, {pipeline_mode = #tpu.pipeline_mode<synchronous>, transform_indices = @transform_1, window_bounds = array<i64: 100, 8>}, {pipeline_mode = #tpu.pipeline_mode<synchronous>, transform_indices = @transform_2, window_bounds = array<i64: 1, 8>}, {pipeline_mode = #tpu.pipeline_mode<synchronous>, transform_indices = @transform_3, window_bounds = array<i64: 1, 8>}, {pipeline_mode = #tpu.pipeline_mode<synchronous>, transform_indices = @transform_4, window_bounds = array<i64: 1, 8>}, {transform_indices = @transform_5, window_bounds = array<i64: 16, 8>}]} {
    %c0 = arith.constant 0 : index
    %c0_0 = arith.constant 0 : index
    %0 = vector.load %arg2[%c0, %c0_0] : memref<100x8xbf16, #tpu.memory_space<vmem>>, vector<100x8xbf16>
    %c0_1 = arith.constant 0 : index
    %c0_2 = arith.constant 0 : index
    %c0_3 = arith.constant 0 : index
    %1 = vector.load %arg1[%c0_1, %c0_2, %c0_3] : memref<4x16x100xbf16, #tpu.memory_space<vmem>>, vector<1x16x100xbf16>
    %2 = vector.shape_cast %1 : vector<1x16x100xbf16> to vector<16x100xbf16>
    %cst = arith.constant dense<0.000000e+00> : vector<16x8xf32>
    %3 = tpu.matmul %2, %0, %cst {dimension_numbers = #tpu.dot_dimension_numbers<[1], [0], [0], [1], [0, 0, 1, 1], [], []>} : vector<16x100xbf16>, vector<100x8xbf16>, vector<16x8xf32> -> vector<16x8xf32>
    %c1 = arith.constant 1 : index
    %c0_4 = arith.constant 0 : index
    %c0_5 = arith.constant 0 : index
    %4 = vector.load %arg1[%c1, %c0_4, %c0_5] : memref<4x16x100xbf16, #tpu.memory_space<vmem>>, vector<1x16x100xbf16>
    %5 = vector.shape_cast %4 : vector<1x16x100xbf16> to vector<16x100xbf16>
    %cst_6 = arith.constant dense<0.000000e+00> : vector<16x8xf32>
    %6 = tpu.matmul %5, %0, %cst_6 {dimension_numbers = #tpu.dot_dimension_numbers<[1], [0], [0], [1], [0, 0, 1, 1], [], []>} : vector<16x100xbf16>, vector<100x8xbf16>, vector<16x8xf32> -> vector<16x8xf32>
    %7 = arith.maximumf %3, %6 : vector<16x8xf32>
    %c2 = arith.constant 2 : index
    %c0_7 = arith.constant 0 : index
    %c0_8 = arith.constant 0 : index
    %8 = vector.load %arg1[%c2, %c0_7, %c0_8] : memref<4x16x100xbf16, #tpu.memory_space<vmem>>, vector<1x16x100xbf16>
    %9 = vector.shape_cast %8 : vector<1x16x100xbf16> to vector<16x100xbf16>
    %cst_9 = arith.constant dense<0.000000e+00> : vector<16x8xf32>
    %10 = tpu.matmul %9, %0, %cst_9 {dimension_numbers = #tpu.dot_dimension_numbers<[1], [0], [0], [1], [0, 0, 1, 1], [], []>} : vector<16x100xbf16>, vector<100x8xbf16>, vector<16x8xf32> -> vector<16x8xf32>
    %11 = arith.maximumf %7, %10 : vector<16x8xf32>
    %c3 = arith.constant 3 : index
    %c0_10 = arith.constant 0 : index
    %c0_11 = arith.constant 0 : index
    %12 = vector.load %arg1[%c3, %c0_10, %c0_11] : memref<4x16x100xbf16, #tpu.memory_space<vmem>>, vector<1x16x100xbf16>
    %13 = vector.shape_cast %12 : vector<1x16x100xbf16> to vector<16x100xbf16>
    %cst_12 = arith.constant dense<0.000000e+00> : vector<16x8xf32>
    %14 = tpu.matmul %13, %0, %cst_12 {dimension_numbers = #tpu.dot_dimension_numbers<[1], [0], [0], [1], [0, 0, 1, 1], [], []>} : vector<16x100xbf16>, vector<100x8xbf16>, vector<16x8xf32> -> vector<16x8xf32>
    %15 = arith.maximumf %11, %14 : vector<16x8xf32>
    %c0_13 = arith.constant 0 : index
    %c0_14 = arith.constant 0 : index
    %16 = vector.load %arg3[%c0_13, %c0_14] : memref<1x8xf32, #tpu.memory_space<vmem>>, vector<1x8xf32>
    %17 = vector.broadcast %16 : vector<1x8xf32> to vector<16x8xf32>
    %18 = arith.addf %15, %17 : vector<16x8xf32>
    %cst_15 = arith.constant 0.000000e+00 : f32
    %19 = vector.broadcast %cst_15 : f32 to vector<16x8xf32>
    %20 = arith.maximumf %18, %19 : vector<16x8xf32>
    %c0_16 = arith.constant 0 : index
    %c0_17 = arith.constant 0 : index
    %21 = vector.load %arg4[%c0_16, %c0_17] : memref<1x8xf32, #tpu.memory_space<vmem>>, vector<1x8xf32>
    %22 = vector.broadcast %21 : vector<1x8xf32> to vector<16x8xf32>
    %23 = arith.mulf %20, %22 : vector<16x8xf32>
    %c0_18 = arith.constant 0 : index
    %c0_19 = arith.constant 0 : index
    %24 = vector.load %arg5[%c0_18, %c0_19] : memref<1x8xf32, #tpu.memory_space<vmem>>, vector<1x8xf32>
    %25 = vector.broadcast %24 : vector<1x8xf32> to vector<16x8xf32>
    %26 = arith.addf %23, %25 : vector<16x8xf32>
    %27 = arith.truncf %26 : vector<16x8xf32> to vector<16x8xbf16>
    %c0_20 = arith.constant 0 : index
    %c0_21 = arith.constant 0 : index
    %28 = vector.load %arg6[%c0_20, %c0_21] : memref<16x8xbf16, #tpu.memory_space<vmem>>, vector<16x8xbf16>
    tpu.vector_store %arg6[%c0_20, %c0_21], %27 {strides = array<i32>} : memref<16x8xbf16, #tpu.memory_space<vmem>>, vector<16x8xbf16>,
    return
  }
  func.func @transform_0(%arg0: i32) -> (i32, i32, i32) {
    %c0_i32 = arith.constant 0 : i32
    %c0_i32_0 = arith.constant 0 : i32
    %c0_i32_1 = arith.constant 0 : i32
    return %c0_i32, %arg0, %c0_i32_0 : i32, i32, i32
  }
  func.func @transform_1(%arg0: i32) -> (i32, i32) {
    %c0_i32 = arith.constant 0 : i32
    %c0_i32_0 = arith.constant 0 : i32
    %c0_i32_1 = arith.constant 0 : i32
    return %c0_i32, %c0_i32_0 : i32, i32
  }
  func.func @transform_2(%arg0: i32) -> (i32, i32) {
    %c0_i32 = arith.constant 0 : i32
    %c0_i32_0 = arith.constant 0 : i32
    %c0_i32_1 = arith.constant 0 : i32
    return %c0_i32, %c0_i32_0 : i32, i32
  }
  func.func @transform_3(%arg0: i32) -> (i32, i32) {
    %c0_i32 = arith.constant 0 : i32
    %c0_i32_0 = arith.constant 0 : i32
    %c0_i32_1 = arith.constant 0 : i32
    return %c0_i32, %c0_i32_0 : i32, i32
  }
  func.func @transform_4(%arg0: i32) -> (i32, i32) {
    %c0_i32 = arith.constant 0 : i32
    %c0_i32_0 = arith.constant 0 : i32
    %c0_i32_1 = arith.constant 0 : i32
    return %c0_i32, %c0_i32_0 : i32, i32
  }
  func.func @transform_5(%arg0: i32) -> (i32, i32) {
    %c0_i32 = arith.constant 0 : i32
    %c0_i32_0 = arith.constant 0 : i32
    return %arg0, %c0_i32 : i32, i32
  }
}

module attributes {stable_mosaic.version = 11 : i64} {
  func.func @_head_kernel(%arg0: memref<2x64xbf16, #tpu.memory_space<vmem>>, %arg1: memref<64x32xbf16, #tpu.memory_space<vmem>>, %arg2: memref<1x32xf32, #tpu.memory_space<vmem>>, %arg3: memref<32x4xbf16, #tpu.memory_space<vmem>>, %arg4: memref<1x4xf32, #tpu.memory_space<vmem>>, %arg5: memref<2x4xf32, #tpu.memory_space<vmem>>) attributes {dimension_semantics = [], scalar_prefetch = 0 : i64, scratch_operands = 0 : i64, tpu.core_type = #tpu.core_type<tc>} {
    %c0 = arith.constant 0 : index
    %c0_0 = arith.constant 0 : index
    %0 = vector.load %arg0[%c0, %c0_0] : memref<2x64xbf16, #tpu.memory_space<vmem>>, vector<2x64xbf16>
    %c0_1 = arith.constant 0 : index
    %c0_2 = arith.constant 0 : index
    %1 = vector.load %arg1[%c0_1, %c0_2] : memref<64x32xbf16, #tpu.memory_space<vmem>>, vector<64x32xbf16>
    %cst = arith.constant dense<0.000000e+00> : vector<2x32xf32>
    %2 = tpu.matmul %0, %1, %cst {dimension_numbers = #tpu.dot_dimension_numbers<[1], [0], [0], [1], [0, 0, 1, 1], [], []>} : vector<2x64xbf16>, vector<64x32xbf16>, vector<2x32xf32> -> vector<2x32xf32>
    %c0_3 = arith.constant 0 : index
    %c0_4 = arith.constant 0 : index
    %3 = vector.load %arg2[%c0_3, %c0_4] : memref<1x32xf32, #tpu.memory_space<vmem>>, vector<1x32xf32>
    %4 = vector.broadcast %3 : vector<1x32xf32> to vector<2x32xf32>
    %5 = arith.addf %2, %4 : vector<2x32xf32>
    %cst_5 = arith.constant 0.000000e+00 : f32
    %6 = vector.broadcast %cst_5 : f32 to vector<2x32xf32>
    %7 = arith.maximumf %5, %6 : vector<2x32xf32>
    %8 = arith.truncf %7 : vector<2x32xf32> to vector<2x32xbf16>
    %c0_6 = arith.constant 0 : index
    %c0_7 = arith.constant 0 : index
    %9 = vector.load %arg3[%c0_6, %c0_7] : memref<32x4xbf16, #tpu.memory_space<vmem>>, vector<32x4xbf16>
    %cst_8 = arith.constant dense<0.000000e+00> : vector<2x4xf32>
    %10 = tpu.matmul %8, %9, %cst_8 {dimension_numbers = #tpu.dot_dimension_numbers<[1], [0], [0], [1], [0, 0, 1, 1], [], []>} : vector<2x32xbf16>, vector<32x4xbf16>, vector<2x4xf32> -> vector<2x4xf32>
    %c0_9 = arith.constant 0 : index
    %c0_10 = arith.constant 0 : index
    %11 = vector.load %arg4[%c0_9, %c0_10] : memref<1x4xf32, #tpu.memory_space<vmem>>, vector<1x4xf32>
    %12 = vector.broadcast %11 : vector<1x4xf32> to vector<2x4xf32>
    %13 = arith.addf %10, %12 : vector<2x4xf32>
    %c0_11 = arith.constant 0 : index
    %c0_12 = arith.constant 0 : index
    %14 = vector.load %arg5[%c0_11, %c0_12] : memref<2x4xf32, #tpu.memory_space<vmem>>, vector<2x4xf32>
    tpu.vector_store %arg5[%c0_11, %c0_12], %13 {strides = array<i32>} : memref<2x4xf32, #tpu.memory_space<vmem>>, vector<2x4xf32>,
    return
  }
}

</mosaic_0001>

<bundles_post_ra>
// kernel: cnn_forward.3
= control target key start
LH: loop header
LB: loop body
LE: loop exit
PB: predicated region body
PF: predicated region fallthrough
CT: control target
= control target key end

     0   :  { %vm815_vm0 = vcmask 27648   ;;  %s1472_s1 = inlined_call_operand.vmem [shape: bf16[128,4], index: 1, kind: input, shape index: {}]   ;;  %s1473_s0 = inlined_call_operand.vmem [shape: bf16[4,160,128], index: 0, kind: input, shape index: {}]   ;;  %s1474_s2 = inlined_call_operand.vmem [shape: f32[1,4], index: 2, kind: input, shape index: {}]   ;;  %s1475_s3 = inlined_call_operand.vmem [shape: f32[1,4], index: 3, kind: input, shape index: {}]   ;;  %s1476_s4 = inlined_call_operand.vmem [shape: f32[1,4], index: 4, kind: input, shape index: {}]   ;;  %s1477_s5 = inlined_call_operand.vmem [shape: bf16[160,4], index: 5, kind: output, shape index: {}]  }
   0x1   :  { %v1099_v0 = vld [vmem:[%s1472_s1 + $0x38] sm:$0xff]  ;;  %v1098_v1 = vld [vmem:[%s1472_s1 + $0x30] sm:$0xff]  ;;  %v1097_v2 = vld [vmem:[%s1472_s1 + $0x28] sm:$0xff] }
   0x2   :  { %164 = vmatpush.bf16.msra.mxu0 %v1099_v0  ;;  %304 = vmatpush.bf16.msra.mxu1 %v1099_v0  ;;  %v1096_v3 = vld [vmem:[%s1472_s1 + $0x20] sm:$0xff]  ;;  %v1095_v4 = vld [vmem:[%s1472_s1 + $0x18] sm:$0xff]  ;;  %v1094_v5 = vld [vmem:[%s1472_s1 + $0x10] sm:$0xff] }
   0x3   :  { %464 = vmatpush.bf16.msra.mxu2 %v1099_v0  ;;  %624 = vmatpush.bf16.msra.mxu3 %v1099_v0  ;;  %v1093_v6 = vld [vmem:[%s1472_s1 + $0x8] sm:$0xff]  ;;  %v1092_v7 = vld [vmem:[%s1472_s1] sm:$0xff]  ;;  %v1110_v9 = vld [vmem:[%s1473_s0 + $0x50] sm:$0xff] }
   0x4   :  { %v1100_v8 = vld [vmem:[%s1473_s0] sm:$0xff]  ;;  %v1130_v11 = vld [vmem:[%s1473_s0 + $0xf0] sm:$0xff]  ;;  %v1101_v12 = vld [vmem:[%s1473_s0 + $0x8] sm:$0xff] }
   0x5   :  { %v1120_v10 = vld [vmem:[%s1473_s0 + $0xa0] sm:$0xff]  ;;  %v1111_v13 = vld [vmem:[%s1473_s0 + $0x58] sm:$0xff]  ;;  %v1121_v14 = vld [vmem:[%s1473_s0 + $0xa8] sm:$0xff] }
   0x6   :  { %165 = vmatpush.bf16.msra.mxu0 %v1098_v1  ;;  %305 = vmatpush.bf16.msra.mxu1 %v1098_v1  ;;  %v1131_v15 = vld [vmem:[%s1473_s0 + $0xf8] sm:$0xff]  ;;  %v1102_v16 = vld [vmem:[%s1473_s0 + $0x10] sm:$0xff]  ;;  %v1112_v17 = vld [vmem:[%s1473_s0 + $0x60] sm:$0xff] }
   0x7   :  { %465 = vmatpush.bf16.msra.mxu2 %v1098_v1  ;;  %625 = vmatpush.bf16.msra.mxu3 %v1098_v1  ;;  %v1122_v18 = vld [vmem:[%s1473_s0 + $0xb0] sm:$0xff]  ;;  %v1132_v19 = vld [vmem:[%s1473_s0 + $0x100] sm:$0xff]  ;;  %v1103_v20 = vld [vmem:[%s1473_s0 + $0x18] sm:$0xff] }
   0x8   :  { %v1113_v21 = vld [vmem:[%s1473_s0 + $0x68] sm:$0xff]  ;;  %v1123_v22 = vld [vmem:[%s1473_s0 + $0xb8] sm:$0xff]  ;;  %v1104_v24 = vld [vmem:[%s1473_s0 + $0x20] sm:$0xff] }
   0x9   :  { %v1133_v23 = vld [vmem:[%s1473_s0 + $0x108] sm:$0xff]  ;;  %v1114_v25 = vld [vmem:[%s1473_s0 + $0x70] sm:$0xff]  ;;  %v1124_v26 = vld [vmem:[%s1473_s0 + $0xc0] sm:$0xff] }
   0xa   :  { %166 = vmatpush.bf16.msra.mxu0 %v1097_v2  ;;  %306 = vmatpush.bf16.msra.mxu1 %v1097_v2  ;;  %v1134_v27 = vld [vmem:[%s1473_s0 + $0x110] sm:$0xff]  ;;  %v1105_v28 = vld [vmem:[%s1473_s0 + $0x28] sm:$0xff]  ;;  %v1115_v29 = vld [vmem:[%s1473_s0 + $0x78] sm:$0xff] }
   0xb   :  { %466 = vmatpush.bf16.msra.mxu2 %v1097_v2  ;;  %626 = vmatpush.bf16.msra.mxu3 %v1097_v2  ;;  %v1125_v30 = vld [vmem:[%s1473_s0 + $0xc8] sm:$0xff]  ;;  %v1135_v31 = vld [vmem:[%s1473_s0 + $0x118] sm:$0xff]  ;;  %v1106_v32 = vld [vmem:[%s1473_s0 + $0x30] sm:$0xff] }
   0xc   :  { %v1116_v33 = vld [vmem:[%s1473_s0 + $0x80] sm:$0xff]  ;;  %v1126_v34 = vld [vmem:[%s1473_s0 + $0xd0] sm:$0xff]  ;;  %v1107_v36 = vld [vmem:[%s1473_s0 + $0x38] sm:$0xff] }
   0xd   :  { %v1136_v35 = vld [vmem:[%s1473_s0 + $0x120] sm:$0xff]  ;;  %v1117_v37 = vld [vmem:[%s1473_s0 + $0x88] sm:$0xff]  ;;  %v1127_v38 = vld [vmem:[%s1473_s0 + $0xd8] sm:$0xff] }
   0xe   :  { %167 = vmatpush.bf16.msra.mxu0 %v1096_v3  ;;  %307 = vmatpush.bf16.msra.mxu1 %v1096_v3  ;;  %v1137_v39 = vld [vmem:[%s1473_s0 + $0x128] sm:$0xff]  ;;  %v1108_v40 = vld [vmem:[%s1473_s0 + $0x40] sm:$0xff]  ;;  %v1118_v41 = vld [vmem:[%s1473_s0 + $0x90] sm:$0xff] }
   0xf   :  { %467 = vmatpush.bf16.msra.mxu2 %v1096_v3  ;;  %627 = vmatpush.bf16.msra.mxu3 %v1096_v3  ;;  %v1128_v44 = vld [vmem:[%s1473_s0 + $0xe0] sm:$0xff]  ;;  %v1138_v45 = vld [vmem:[%s1473_s0 + $0x130] sm:$0xff]  ;;  %v1109_v61 = vld [vmem:[%s1473_s0 + $0x48] sm:$0xff] }
  0x10   :  { %v1308_v50 = vld [vmem:[%s1474_s2] ss:$0 sm:$0xff]  ;;  %v1119_v62 = vld [vmem:[%s1473_s0 + $0x98] sm:$0xff]  ;;  %v1129_v3 = vld [vmem:[%s1473_s0 + $0xe8] sm:$0xff] }
  0x11   :  { %v1314_v55 = vld [vmem:[%s1475_s3] ss:$0 sm:$0xff] }
  0x12   :  { %168 = vmatpush.bf16.msra.mxu0 %v1095_v4  ;;  %308 = vmatpush.bf16.msra.mxu1 %v1095_v4  ;;  %v1319_v57 = vld [vmem:[%s1476_s4] ss:$0 sm:$0xff] }
  0x13   :  { %468 = vmatpush.bf16.msra.mxu2 %v1095_v4  ;;  %628 = vmatpush.bf16.msra.mxu3 %v1095_v4  ;;  %v1139_v4 = vld [vmem:[%s1473_s0 + $0x138] sm:$0xff] }
  0x16   :  { %169 = vmatpush.bf16.msra.mxu0 %v1094_v5  ;;  %309 = vmatpush.bf16.msra.mxu1 %v1094_v5 }
  0x17   :  { %469 = vmatpush.bf16.msra.mxu2 %v1094_v5  ;;  %629 = vmatpush.bf16.msra.mxu3 %v1094_v5 }
  0x1a   :  { %170 = vmatpush.bf16.msra.mxu0 %v1093_v6  ;;  %310 = vmatpush.bf16.msra.mxu1 %v1093_v6 }
  0x1b   :  { %470 = vmatpush.bf16.msra.mxu2 %v1093_v6  ;;  %630 = vmatpush.bf16.msra.mxu3 %v1093_v6 }
  0x1e   :  { %171 = vmatpush.bf16.msra.mxu0 %v1092_v7  ;;  %311 = vmatpush.bf16.msra.mxu1 %v1092_v7 }
  0x1f   :  { %471 = vmatpush.bf16.msra.mxu2 %v1092_v7  ;;  %631 = vmatpush.bf16.msra.mxu3 %v1092_v7 }
  0x21   :  { %172 = vmatmul.bf16.vlgmr.msra.gmra.mxu0 %v1100_v8  ;;  %312 = vmatmul.bf16.vlgmr.msra.gmra.mxu1 %v1110_v9 }
  0x22   :  { %472 = vmatmul.bf16.vlgmr.msra.gmra.mxu2 %v1120_v10  ;;  %632 = vmatmul.bf16.vlgmr.msra.gmra.mxu3 %v1130_v11 }
  0x31   :  { %177 = vmatmul.bf16.gmra.mxu0 %v1101_v12  ;;  %317 = vmatmul.bf16.gmra.mxu1 %v1111_v13 }
  0x32   :  { %477 = vmatmul.bf16.gmra.mxu2 %v1121_v14  ;;  %637 = vmatmul.bf16.gmra.mxu3 %v1131_v15 }
  0x41   :  { %182 = vmatmul.bf16.gmra.mxu0 %v1102_v16  ;;  %322 = vmatmul.bf16.gmra.mxu1 %v1112_v17 }
  0x42   :  { %482 = vmatmul.bf16.gmra.mxu2 %v1122_v18  ;;  %642 = vmatmul.bf16.gmra.mxu3 %v1132_v19 }
  0x51   :  { %187 = vmatmul.bf16.gmra.mxu0 %v1103_v20  ;;  %327 = vmatmul.bf16.gmra.mxu1 %v1113_v21 }
  0x52   :  { %487 = vmatmul.bf16.gmra.mxu2 %v1123_v22  ;;  %647 = vmatmul.bf16.gmra.mxu3 %v1133_v23 }
  0x61   :  { %192 = vmatmul.bf16.gmra.mxu0 %v1104_v24  ;;  %332 = vmatmul.bf16.gmra.mxu1 %v1114_v25 }
  0x62   :  { %492 = vmatmul.bf16.gmra.mxu2 %v1124_v26  ;;  %652 = vmatmul.bf16.gmra.mxu3 %v1134_v27 }
  0x71   :  { %197 = vmatmul.bf16.gmra.mxu0 %v1105_v28  ;;  %337 = vmatmul.bf16.gmra.mxu1 %v1115_v29 }
  0x72   :  { %497 = vmatmul.bf16.gmra.mxu2 %v1125_v30  ;;  %657 = vmatmul.bf16.gmra.mxu3 %v1135_v31 }
  0x81   :  { %202 = vmatmul.bf16.gmra.mxu0 %v1106_v32  ;;  %342 = vmatmul.bf16.gmra.mxu1 %v1116_v33 }
  0x82   :  { %502 = vmatmul.bf16.gmra.mxu2 %v1126_v34  ;;  %662 = vmatmul.bf16.gmra.mxu3 %v1136_v35 }
  0x91   :  { %207 = vmatmul.bf16.gmra.mxu0 %v1107_v36  ;;  %347 = vmatmul.bf16.gmra.mxu1 %v1117_v37 }
  0x92   :  { %507 = vmatmul.bf16.gmra.mxu2 %v1127_v38  ;;  %667 = vmatmul.bf16.gmra.mxu3 %v1137_v39 }
  0x9e   :  { %v173_v42 = vpop.f32.mrf.mxu0  ;;  %v313_v43 = vpop.f32.mrf.mxu1 }
  0x9f   :  { %v363_v46 = vmax.f32 %v173_v42, %v313_v43 }
  0xa1   :  { %212 = vmatmul.bf16.gmra.mxu0 %v1108_v40  ;;  %352 = vmatmul.bf16.gmra.mxu1 %v1118_v41 }
  0xa2   :  { %512 = vmatmul.bf16.gmra.mxu2 %v1128_v44  ;;  %672 = vmatmul.bf16.gmra.mxu3 %v1138_v45 }
  0xa5   :  { %v473_v47 = vpop.f32.mrf.mxu2  ;;  %v633_v48 = vpop.f32.mrf.mxu3 }
  0xa6   :  { %v523_v49 = vmax.f32 %v363_v46, %v473_v47  ;;  %v175_v51 = vpop.f32.mrf.mxu0  ;;  %v315_v52 = vpop.f32.mrf.mxu1 }
  0xa7   :  { %v364_v58 = vmax.f32 %v175_v51, %v315_v52 }
  0xa8   :  { %v683_v53 = vmax.f32 %v523_v49, %v633_v48 }
  0xaa   :  { %v707_v54 = vadd.f32 %v1308_v50, %v683_v53 }
  0xac   :  { %v727_v56 = vmax.f32 %v707_v54, 0.0 }
  0xad   :  { %v475_v59 = vpop.f32.mrf.mxu2  ;;  %v635_v60 = vpop.f32.mrf.mxu3 }
  0xae   :  { %v751_v63 = vmul.f32 %v1314_v55, %v727_v56  ;;  %v524_v0 = vmax.f32 %v364_v58, %v475_v59  ;;  %v178_v1 = vpop.f32.mrf.mxu0  ;;  %v318_v2 = vpop.f32.mrf.mxu1 }
  0xaf   :  { %v365_v9 = vmax.f32 %v178_v1, %v318_v2 }
  0xb0   :  { %v775_v5 = vadd.f32 %v1319_v57, %v751_v63  ;;  %v684_v6 = vmax.f32 %v524_v0, %v635_v60 }
  0xb1   :  { %217 = vmatmul.bf16.gmra.mxu0 %v1109_v61  ;;  %357 = vmatmul.bf16.gmra.mxu1 %v1119_v62 }
  0xb2   :  { %v795_v7 = vpack.c.bf16 %v775_v5, %v775_v5  ;;  %v708_v8 = vadd.f32 %v1308_v50, %v684_v6  ;;  %517 = vmatmul.bf16.gmra.mxu2 %v1129_v3  ;;  %677 = vmatmul.bf16.gmra.mxu3 %v1139_v4 }
  0xb4   :  { %816 = vst.msk [vmem:[%s1477_s5] sm:$0xf] %vm815_vm0, %v795_v7  ;;  %v728_v10 = vmax.f32 %v708_v8, 0.0 }
  0xb5   :  { %v478_v11 = vpop.f32.mrf.mxu2  ;;  %v638_v12 = vpop.f32.mrf.mxu3 }
  0xb6   :  { %v752_v13 = vmul.f32 %v1314_v55, %v728_v10  ;;  %v525_v14 = vmax.f32 %v365_v9, %v478_v11  ;;  %v180_v15 = vpop.f32.mrf.mxu0  ;;  %v320_v16 = vpop.f32.mrf.mxu1 }
  0xb7   :  { %v366_v22 = vmax.f32 %v180_v15, %v320_v16 }
  0xb8   :  { %v776_v17 = vadd.f32 %v1319_v57, %v752_v13  ;;  %v685_v18 = vmax.f32 %v525_v14, %v638_v12 }
  0xba   :  { %v796_v19 = vpack.c.bf16 %v776_v17, %v776_v17  ;;  %v709_v20 = vadd.f32 %v1308_v50, %v685_v18 }
  0xbc   :  { %817 = vst.msk [vmem:[%s1477_s5 + $0x4] sm:$0xf] %vm815_vm0, %v796_v19  ;;  %v729_v21 = vmax.f32 %v709_v20, 0.0 }
  0xbd   :  { %v480_v23 = vpop.f32.mrf.mxu2  ;;  %v640_v24 = vpop.f32.mrf.mxu3 }
  0xbe   :  { %v753_v25 = vmul.f32 %v1314_v55, %v729_v21  ;;  %v526_v26 = vmax.f32 %v366_v22, %v480_v23  ;;  %v183_v27 = vpop.f32.mrf.mxu0  ;;  %v323_v28 = vpop.f32.mrf.mxu1 }
  0xbf   :  { %v367_v33 = vmax.f32 %v183_v27, %v323_v28 }
  0xc0   :  { %v777_v29 = vadd.f32 %v1319_v57, %v753_v25  ;;  %v686_v30 = vmax.f32 %v526_v26, %v640_v24 }
  0xc2   :  { %v797_v31 = vpack.c.bf16 %v777_v29, %v777_v29  ;;  %v710_v32 = vadd.f32 %v1308_v50, %v686_v30 }
  0xc4   :  { %818 = vst.msk [vmem:[%s1477_s5 + $0x8] sm:$0xf] %vm815_vm0, %v797_v31  ;;  %v730_v34 = vmax.f32 %v710_v32, 0.0 }
  0xc5   :  { %v483_v35 = vpop.f32.mrf.mxu2  ;;  %v643_v36 = vpop.f32.mrf.mxu3 }
  0xc6   :  { %v754_v37 = vmul.f32 %v1314_v55, %v730_v34  ;;  %v527_v38 = vmax.f32 %v367_v33, %v483_v35  ;;  %v185_v39 = vpop.f32.mrf.mxu0  ;;  %v325_v40 = vpop.f32.mrf.mxu1 }
  0xc7   :  { %v368_v46 = vmax.f32 %v185_v39, %v325_v40 }
  0xc8   :  { %v778_v41 = vadd.f32 %v1319_v57, %v754_v37  ;;  %v687_v42 = vmax.f32 %v527_v38, %v643_v36 }
  0xca   :  { %v798_v43 = vpack.c.bf16 %v778_v41, %v778_v41  ;;  %v711_v44 = vadd.f32 %v1308_v50, %v687_v42 }
  0xcc   :  { %819 = vst.msk [vmem:[%s1477_s5 + $0xc] sm:$0xf] %vm815_vm0, %v798_v43  ;;  %v731_v45 = vmax.f32 %v711_v44, 0.0 }
  0xcd   :  { %v485_v47 = vpop.f32.mrf.mxu2  ;;  %v645_v48 = vpop.f32.mrf.mxu3 }
  0xce   :  { %v755_v49 = vmul.f32 %v1314_v55, %v731_v45  ;;  %v528_v51 = vmax.f32 %v368_v46, %v485_v47  ;;  %v188_v52 = vpop.f32.mrf.mxu0  ;;  %v328_v53 = vpop.f32.mrf.mxu1 }
  0xcf   :  { %v369_v60 = vmax.f32 %v188_v52, %v328_v53 }
  0xd0   :  { %v779_v54 = vadd.f32 %v1319_v57, %v755_v49  ;;  %v688_v56 = vmax.f32 %v528_v51, %v645_v48 }
  0xd2   :  { %v799_v58 = vpack.c.bf16 %v779_v54, %v779_v54  ;;  %v712_v59 = vadd.f32 %v1308_v50, %v688_v56 }
  0xd4   :  { %820 = vst.msk [vmem:[%s1477_s5 + $0x10] sm:$0xf] %vm815_vm0, %v799_v58  ;;  %v732_v61 = vmax.f32 %v712_v59, 0.0 }
  0xd5   :  { %v488_v62 = vpop.f32.mrf.mxu2  ;;  %v648_v63 = vpop.f32.mrf.mxu3 }
  0xd6   :  { %v756_v0 = vmul.f32 %v1314_v55, %v732_v61  ;;  %v529_v1 = vmax.f32 %v369_v60, %v488_v62  ;;  %v190_v2 = vpop.f32.mrf.mxu0  ;;  %v330_v3 = vpop.f32.mrf.mxu1 }
  0xd7   :  { %v370_v9 = vmax.f32 %v190_v2, %v330_v3 }
  0xd8   :  { %v780_v4 = vadd.f32 %v1319_v57, %v756_v0  ;;  %v689_v5 = vmax.f32 %v529_v1, %v648_v63 }
  0xda   :  { %v800_v6 = vpack.c.bf16 %v780_v4, %v780_v4  ;;  %v713_v7 = vadd.f32 %v1308_v50, %v689_v5 }
  0xdc   :  { %821 = vst.msk [vmem:[%s1477_s5 + $0x14] sm:$0xf] %vm815_vm0, %v800_v6  ;;  %v733_v8 = vmax.f32 %v713_v7, 0.0 }
  0xdd   :  { %v490_v10 = vpop.f32.mrf.mxu2  ;;  %v650_v11 = vpop.f32.mrf.mxu3 }
  0xde   :  { %v757_v12 = vmul.f32 %v1314_v55, %v733_v8  ;;  %v530_v13 = vmax.f32 %v370_v9, %v490_v10  ;;  %v193_v14 = vpop.f32.mrf.mxu0  ;;  %v333_v15 = vpop.f32.mrf.mxu1 }
  0xdf   :  { %v371_v20 = vmax.f32 %v193_v14, %v333_v15 }
  0xe0   :  { %v781_v16 = vadd.f32 %v1319_v57, %v757_v12  ;;  %v690_v17 = vmax.f32 %v530_v13, %v650_v11 }
  0xe2   :  { %v801_v18 = vpack.c.bf16 %v781_v16, %v781_v16  ;;  %v714_v19 = vadd.f32 %v1308_v50, %v690_v17 }
  0xe4   :  { %822 = vst.msk [vmem:[%s1477_s5 + $0x18] sm:$0xf] %vm815_vm0, %v801_v18  ;;  %v734_v21 = vmax.f32 %v714_v19, 0.0 }
  0xe5   :  { %v493_v22 = vpop.f32.mrf.mxu2  ;;  %v653_v23 = vpop.f32.mrf.mxu3 }
  0xe6   :  { %v758_v24 = vmul.f32 %v1314_v55, %v734_v21  ;;  %v531_v25 = vmax.f32 %v371_v20, %v493_v22  ;;  %v195_v26 = vpop.f32.mrf.mxu0  ;;  %v335_v27 = vpop.f32.mrf.mxu1 }
  0xe7   :  { %v372_v33 = vmax.f32 %v195_v26, %v335_v27 }
  0xe8   :  { %v782_v28 = vadd.f32 %v1319_v57, %v758_v24  ;;  %v691_v29 = vmax.f32 %v531_v25, %v653_v23 }
  0xea   :  { %v802_v30 = vpack.c.bf16 %v782_v28, %v782_v28  ;;  %v715_v31 = vadd.f32 %v1308_v50, %v691_v29 }
  0xec   :  { %823 = vst.msk [vmem:[%s1477_s5 + $0x1c] sm:$0xf] %vm815_vm0, %v802_v30  ;;  %v735_v32 = vmax.f32 %v715_v31, 0.0 }
  0xed   :  { %v495_v34 = vpop.f32.mrf.mxu2  ;;  %v655_v35 = vpop.f32.mrf.mxu3 }
  0xee   :  { %v759_v36 = vmul.f32 %v1314_v55, %v735_v32  ;;  %v532_v37 = vmax.f32 %v372_v33, %v495_v34  ;;  %v198_v38 = vpop.f32.mrf.mxu0  ;;  %v338_v39 = vpop.f32.mrf.mxu1 }
  0xef   :  { %v373_v44 = vmax.f32 %v198_v38, %v338_v39 }
  0xf0   :  { %v783_v40 = vadd.f32 %v1319_v57, %v759_v36  ;;  %v692_v41 = vmax.f32 %v532_v37, %v655_v35 }
  0xf2   :  { %v803_v42 = vpack.c.bf16 %v783_v40, %v783_v40  ;;  %v716_v43 = vadd.f32 %v1308_v50, %v692_v41 }
  0xf4   :  { %824 = vst.msk [vmem:[%s1477_s5 + $0x20] sm:$0xf] %vm815_vm0, %v803_v42  ;;  %v736_v45 = vmax.f32 %v716_v43, 0.0 }
  0xf5   :  { %v498_v46 = vpop.f32.mrf.mxu2  ;;  %v658_v47 = vpop.f32.mrf.mxu3 }
  0xf6   :  { %v760_v48 = vmul.f32 %v1314_v55, %v736_v45  ;;  %v533_v49 = vmax.f32 %v373_v44, %v498_v46  ;;  %v200_v51 = vpop.f32.mrf.mxu0  ;;  %v340_v52 = vpop.f32.mrf.mxu1 }
  0xf7   :  { %v374_v60 = vmax.f32 %v200_v51, %v340_v52 }
  0xf8   :  { %v784_v53 = vadd.f32 %v1319_v57, %v760_v48  ;;  %v693_v54 = vmax.f32 %v533_v49, %v658_v47 }
  0xfa   :  { %v804_v56 = vpack.c.bf16 %v784_v53, %v784_v53  ;;  %v717_v58 = vadd.f32 %v1308_v50, %v693_v54 }
  0xfc   :  { %825 = vst.msk [vmem:[%s1477_s5 + $0x24] sm:$0xf] %vm815_vm0, %v804_v56  ;;  %v737_v59 = vmax.f32 %v717_v58, 0.0 }
  0xfd   :  { %v500_v61 = vpop.f32.mrf.mxu2  ;;  %v660_v62 = vpop.f32.mrf.mxu3 }
  0xfe   :  { %v761_v63 = vmul.f32 %v1314_v55, %v737_v59  ;;  %v534_v0 = vmax.f32 %v374_v60, %v500_v61  ;;  %v203_v1 = vpop.f32.mrf.mxu0  ;;  %v343_v2 = vpop.f32.mrf.mxu1 }
  0xff   :  { %v375_v7 = vmax.f32 %v203_v1, %v343_v2 }
 0x100   :  { %v785_v3 = vadd.f32 %v1319_v57, %v761_v63  ;;  %v694_v4 = vmax.f32 %v534_v0, %v660_v62 }
 0x102   :  { %v805_v5 = vpack.c.bf16 %v785_v3, %v785_v3  ;;  %v718_v6 = vadd.f32 %v1308_v50, %v694_v4 }
 0x104   :  { %826 = vst.msk [vmem:[%s1477_s5 + $0x28] sm:$0xf] %vm815_vm0, %v805_v5  ;;  %v738_v8 = vmax.f32 %v718_v6, 0.0 }
 0x105   :  { %v503_v9 = vpop.f32.mrf.mxu2  ;;  %v663_v10 = vpop.f32.mrf.mxu3 }
 0x106   :  { %v762_v11 = vmul.f32 %v1314_v55, %v738_v8  ;;  %v535_v12 = vmax.f32 %v375_v7, %v503_v9  ;;  %v205_v13 = vpop.f32.mrf.mxu0  ;;  %v345_v14 = vpop.f32.mrf.mxu1 }
 0x107   :  { %v376_v20 = vmax.f32 %v205_v13, %v345_v14 }
 0x108   :  { %v786_v15 = vadd.f32 %v1319_v57, %v762_v11  ;;  %v695_v16 = vmax.f32 %v535_v12, %v663_v10 }
 0x10a   :  { %v806_v17 = vpack.c.bf16 %v786_v15, %v786_v15  ;;  %v719_v18 = vadd.f32 %v1308_v50, %v695_v16 }
 0x10c   :  { %827 = vst.msk [vmem:[%s1477_s5 + $0x2c] sm:$0xf] %vm815_vm0, %v806_v17  ;;  %v739_v19 = vmax.f32 %v719_v18, 0.0 }
 0x10d   :  { %v505_v21 = vpop.f32.mrf.mxu2  ;;  %v665_v22 = vpop.f32.mrf.mxu3 }
 0x10e   :  { %v763_v23 = vmul.f32 %v1314_v55, %v739_v19  ;;  %v536_v24 = vmax.f32 %v376_v20, %v505_v21  ;;  %v208_v25 = vpop.f32.mrf.mxu0  ;;  %v348_v26 = vpop.f32.mrf.mxu1 }
 0x10f   :  { %v377_v31 = vmax.f32 %v208_v25, %v348_v26 }
 0x110   :  { %v787_v27 = vadd.f32 %v1319_v57, %v763_v23  ;;  %v696_v28 = vmax.f32 %v536_v24, %v665_v22 }
 0x112   :  { %v807_v29 = vpack.c.bf16 %v787_v27, %v787_v27  ;;  %v720_v30 = vadd.f32 %v1308_v50, %v696_v28 }
 0x114   :  { %828 = vst.msk [vmem:[%s1477_s5 + $0x30] sm:$0xf] %vm815_vm0, %v807_v29  ;;  %v740_v32 = vmax.f32 %v720_v30, 0.0 }
 0x115   :  { %v508_v33 = vpop.f32.mrf.mxu2  ;;  %v668_v34 = vpop.f32.mrf.mxu3 }
 0x116   :  { %v764_v35 = vmul.f32 %v1314_v55, %v740_v32  ;;  %v537_v36 = vmax.f32 %v377_v31, %v508_v33  ;;  %v210_v37 = vpop.f32.mrf.mxu0  ;;  %v350_v38 = vpop.f32.mrf.mxu1 }
 0x117   :  { %v378_v44 = vmax.f32 %v210_v37, %v350_v38 }
 0x118   :  { %v788_v39 = vadd.f32 %v1319_v57, %v764_v35  ;;  %v697_v40 = vmax.f32 %v537_v36, %v668_v34 }
 0x11a   :  { %v808_v41 = vpack.c.bf16 %v788_v39, %v788_v39  ;;  %v721_v42 = vadd.f32 %v1308_v50, %v697_v40 }
 0x11c   :  { %829 = vst.msk [vmem:[%s1477_s5 + $0x34] sm:$0xf] %vm815_vm0, %v808_v41  ;;  %v741_v43 = vmax.f32 %v721_v42, 0.0 }
 0x11d   :  { %v510_v45 = vpop.f32.mrf.mxu2  ;;  %v670_v46 = vpop.f32.mrf.mxu3 }
 0x11e   :  { %v765_v47 = vmul.f32 %v1314_v55, %v741_v43  ;;  %v538_v48 = vmax.f32 %v378_v44, %v510_v45  ;;  %v213_v49 = vpop.f32.mrf.mxu0  ;;  %v353_v51 = vpop.f32.mrf.mxu1 }
 0x11f   :  { %v379_v58 = vmax.f32 %v213_v49, %v353_v51 }
 0x120   :  { %v789_v52 = vadd.f32 %v1319_v57, %v765_v47  ;;  %v698_v53 = vmax.f32 %v538_v48, %v670_v46 }
 0x122   :  { %v809_v54 = vpack.c.bf16 %v789_v52, %v789_v52  ;;  %v722_v56 = vadd.f32 %v1308_v50, %v698_v53 }
 0x124   :  { %830 = vst.msk [vmem:[%s1477_s5 + $0x38] sm:$0xf] %vm815_vm0, %v809_v54  ;;  %v742_v59 = vmax.f32 %v722_v56, 0.0 }
 0x125   :  { %v513_v60 = vpop.f32.mrf.mxu2  ;;  %v673_v61 = vpop.f32.mrf.mxu3 }
 0x126   :  { %v766_v62 = vmul.f32 %v1314_v55, %v742_v59  ;;  %v539_v63 = vmax.f32 %v379_v58, %v513_v60  ;;  %v215_v0 = vpop.f32.mrf.mxu0  ;;  %v355_v1 = vpop.f32.mrf.mxu1 }
 0x127   :  { %v380_v7 = vmax.f32 %v215_v0, %v355_v1 }
 0x128   :  { %v790_v2 = vadd.f32 %v1319_v57, %v766_v62  ;;  %v699_v3 = vmax.f32 %v539_v63, %v673_v61 }
 0x12a   :  { %v810_v4 = vpack.c.bf16 %v790_v2, %v790_v2  ;;  %v723_v5 = vadd.f32 %v1308_v50, %v699_v3 }
 0x12c   :  { %831 = vst.msk [vmem:[%s1477_s5 + $0x3c] sm:$0xf] %vm815_vm0, %v810_v4  ;;  %v743_v6 = vmax.f32 %v723_v5, 0.0 }
 0x12d   :  { %v515_v8 = vpop.f32.mrf.mxu2  ;;  %v675_v9 = vpop.f32.mrf.mxu3 }
 0x12e   :  { %v767_v10 = vmul.f32 %v1314_v55, %v743_v6  ;;  %v540_v11 = vmax.f32 %v380_v7, %v515_v8  ;;  %v218_v12 = vpop.f32.mrf.mxu0  ;;  %v358_v13 = vpop.f32.mrf.mxu1 }
 0x12f   :  { %v381_v18 = vmax.f32 %v218_v12, %v358_v13 }
 0x130   :  { %v791_v14 = vadd.f32 %v1319_v57, %v767_v10  ;;  %v700_v15 = vmax.f32 %v540_v11, %v675_v9 }
 0x132   :  { %v811_v16 = vpack.c.bf16 %v791_v14, %v791_v14  ;;  %v724_v17 = vadd.f32 %v1308_v50, %v700_v15 }
 0x134   :  { %832 = vst.msk [vmem:[%s1477_s5 + $0x40] sm:$0xf] %vm815_vm0, %v811_v16  ;;  %v744_v19 = vmax.f32 %v724_v17, 0.0 }
 0x135   :  { %v518_v20 = vpop.f32.mrf.mxu2  ;;  %v678_v21 = vpop.f32.mrf.mxu3 }
 0x136   :  { %v768_v22 = vmul.f32 %v1314_v55, %v744_v19  ;;  %v541_v23 = vmax.f32 %v381_v18, %v518_v20  ;;  %v220_v26 = vpop.f32.mrf.mxu0  ;;  %v360_v27 = vpop.f32.mrf.mxu1 }
 0x137   :  { %v382_v31 = vmax.f32 %v220_v26, %v360_v27 }
 0x138   :  { %v792_v24 = vadd.f32 %v1319_v57, %v768_v22  ;;  %v701_v25 = vmax.f32 %v541_v23, %v678_v21 }
 0x13a   :  { %v812_v28 = vpack.c.bf16 %v792_v24, %v792_v24  ;;  %v725_v29 = vadd.f32 %v1308_v50, %v701_v25 }
 0x13c   :  { %833 = vst.msk [vmem:[%s1477_s5 + $0x44] sm:$0xf] %vm815_vm0, %v812_v28  ;;  %v745_v30 = vmax.f32 %v725_v29, 0.0 }
 0x13d   :  { %v520_v32 = vpop.f32.mrf.mxu2  ;;  %v680_v35 = vpop.f32.mrf.mxu3 }
 0x13e   :  { %v769_v33 = vmul.f32 %v1314_v55, %v745_v30  ;;  %v542_v34 = vmax.f32 %v382_v31, %v520_v32 }
 0x140   :  { %v793_v36 = vadd.f32 %v1319_v57, %v769_v33  ;;  %v702_v37 = vmax.f32 %v542_v34, %v680_v35 }
 0x142   :  { %v813_v38 = vpack.c.bf16 %v793_v36, %v793_v36  ;;  %v726_v39 = vadd.f32 %v1308_v50, %v702_v37 }
 0x144   :  { %834 = vst.msk [vmem:[%s1477_s5 + $0x48] sm:$0xf] %vm815_vm0, %v813_v38  ;;  %v746_v40 = vmax.f32 %v726_v39, 0.0 }
 0x146   :  { %v770_v41 = vmul.f32 %v1314_v55, %v746_v40 }
 0x148   :  { %v794_v42 = vadd.f32 %v1319_v57, %v770_v41 }
 0x14a   :  { %v814_v43 = vpack.c.bf16 %v794_v42, %v794_v42 }
 0x14c   :  { %835 = vst.msk [vmem:[%s1477_s5 + $0x4c] sm:$0xf] %vm815_vm0, %v814_v43 }

// kernel: cnn_forward.4
= control target key start
LH: loop header
LB: loop body
LE: loop exit
PB: predicated region body
PF: predicated region fallthrough
CT: control target
= control target key end

     0   :  { %vm84_vm0 = vcmask 1041408   ;;  %vm80_vm1 = vcmask 818176   ;;  %vm205_vm2 = vcmask 60416   ;;  %s353_s1 = inlined_call_operand.vmem [shape: bf16[100,8], index: 1, kind: input, shape index: {}]   ;;  %s354_s0 = inlined_call_operand.vmem [shape: bf16[4,16,100], index: 0, kind: input, shape index: {}]   ;;  %s355_s2 = inlined_call_operand.vmem [shape: f32[1,8], index: 2, kind: input, shape index: {}]   ;;  %s356_s3 = inlined_call_operand.vmem [shape: f32[1,8], index: 3, kind: input, shape index: {}]   ;;  %s357_s4 = inlined_call_operand.vmem [shape: f32[1,8], index: 4, kind: input, shape index: {}]   ;;  %s358_s5 = inlined_call_operand.vmem [shape: bf16[16,8], index: 5, kind: output, shape index: {}]  }
   0x1   :  { %v33_v0 = vld [vmem:[%s353_s1 + $0x30] sm:$0x3]  ;;  %v267_v4 = vld [vmem:[%s353_s1 + $0x28] sm:$0xff]  ;;  %v266_v5 = vld [vmem:[%s353_s1 + $0x20] sm:$0xff] }
   0x2   :  { %v66_v1 = vunpack.c.l.b16 %v33_v0  ;;  %v265_v6 = vld [vmem:[%s353_s1 + $0x18] sm:$0xff]  ;;  %v264_v7 = vld [vmem:[%s353_s1 + $0x10] sm:$0xff]  ;;  %v263_v8 = vld [vmem:[%s353_s1 + $0x8] sm:$0xff] }
   0x3   :  { %v262_v9 = vld [vmem:[%s353_s1] sm:$0xff]  ;;  %v269_v11 = vld [vmem:[%s354_s0 + $0x8] sm:$0xff]  ;;  %v270_v12 = vld [vmem:[%s354_s0 + $0x10] sm:$0xff] }
   0x4   :  { %v73_v2 = vpack.c.b16 %v66_v1, %v66_v1  ;;  %v268_v10 = vld [vmem:[%s354_s0] sm:$0xff]  ;;  %v271_v13 = vld [vmem:[%s354_s0 + $0x18] sm:$0xff] }
   0x5   :  { %v272_v20 = vld [vmem:[%s355_s2] ss:$0 sm:$0xff] }
   0x6   :  { %v86_v3 = vsel %vm84_vm0, %v73_v2, 0  ;;  %v273_v25 = vld [vmem:[%s356_s3] ss:$0 sm:$0xff] }
   0x7   :  { %89 = vmatpush.bf16.msra.mxu0 %v86_v3  ;;  %114 = vmatpush.bf16.msra.mxu1 %v86_v3  ;;  %v274_v27 = vld [vmem:[%s357_s4] ss:$0 sm:$0xff] }
   0x8   :  { %141 = vmatpush.bf16.msra.mxu2 %v86_v3  ;;  %168 = vmatpush.bf16.msra.mxu3 %v86_v3 }
   0xb   :  { %90 = vmatpush.bf16.msra.mxu0 %v267_v4  ;;  %115 = vmatpush.bf16.msra.mxu1 %v267_v4 }
   0xc   :  { %142 = vmatpush.bf16.msra.mxu2 %v267_v4  ;;  %169 = vmatpush.bf16.msra.mxu3 %v267_v4 }
   0xf   :  { %91 = vmatpush.bf16.msra.mxu0 %v266_v5  ;;  %116 = vmatpush.bf16.msra.mxu1 %v266_v5 }
  0x10   :  { %143 = vmatpush.bf16.msra.mxu2 %v266_v5  ;;  %170 = vmatpush.bf16.msra.mxu3 %v266_v5 }
  0x13   :  { %92 = vmatpush.bf16.msra.mxu0 %v265_v6  ;;  %117 = vmatpush.bf16.msra.mxu1 %v265_v6 }
  0x14   :  { %144 = vmatpush.bf16.msra.mxu2 %v265_v6  ;;  %171 = vmatpush.bf16.msra.mxu3 %v265_v6 }
  0x17   :  { %93 = vmatpush.bf16.msra.mxu0 %v264_v7  ;;  %118 = vmatpush.bf16.msra.mxu1 %v264_v7 }
  0x18   :  { %145 = vmatpush.bf16.msra.mxu2 %v264_v7  ;;  %172 = vmatpush.bf16.msra.mxu3 %v264_v7 }
  0x1b   :  { %94 = vmatpush.bf16.msra.mxu0 %v263_v8  ;;  %119 = vmatpush.bf16.msra.mxu1 %v263_v8 }
  0x1c   :  { %146 = vmatpush.bf16.msra.mxu2 %v263_v8  ;;  %173 = vmatpush.bf16.msra.mxu3 %v263_v8 }
  0x1f   :  { %95 = vmatpush.bf16.msra.mxu0 %v262_v9  ;;  %120 = vmatpush.bf16.msra.mxu1 %v262_v9 }
  0x20   :  { %147 = vmatpush.bf16.msra.mxu2 %v262_v9  ;;  %174 = vmatpush.bf16.msra.mxu3 %v262_v9 }
  0x22   :  { %240 = vmatmul.msk.bf16.vlgmr.msra.gmra.mxu0 %vm80_vm1, %v268_v10  ;;  %247 = vmatmul.msk.bf16.vlgmr.msra.gmra.mxu1 %vm80_vm1, %v269_v11 }
  0x23   :  { %254 = vmatmul.msk.bf16.vlgmr.msra.gmra.mxu2 %vm80_vm1, %v270_v12  ;;  %261 = vmatmul.msk.bf16.vlgmr.msra.gmra.mxu3 %vm80_vm1, %v271_v13 }
  0x9f   :  { %v97_v14 = vpop.f32.mrf.mxu0  ;;  %v122_v15 = vpop.f32.mrf.mxu1 }
  0xa0   :  { %v127_v16 = vmax.f32 %v97_v14, %v122_v15 }
  0xa6   :  { %v149_v17 = vpop.f32.mrf.mxu2  ;;  %v176_v18 = vpop.f32.mrf.mxu3 }
  0xa7   :  { %v154_v19 = vmax.f32 %v127_v16, %v149_v17  ;;  %v99_v22 = vpop.f32.mrf.mxu0  ;;  %v124_v23 = vpop.f32.mrf.mxu1 }
  0xa8   :  { %v128_v28 = vmax.f32 %v99_v22, %v124_v23 }
  0xa9   :  { %v181_v21 = vmax.f32 %v154_v19, %v176_v18 }
  0xab   :  { %v187_v24 = vadd.f32 %v272_v20, %v181_v21 }
  0xad   :  { %v189_v26 = vmax.f32 %v187_v24, 0.0 }
  0xae   :  { %v151_v29 = vpop.f32.mrf.mxu2  ;;  %v178_v32 = vpop.f32.mrf.mxu3 }
  0xaf   :  { %v195_v30 = vmul.f32 %v273_v25, %v189_v26  ;;  %v155_v31 = vmax.f32 %v128_v28, %v151_v29 }
  0xb1   :  { %v201_v33 = vadd.f32 %v274_v27, %v195_v30  ;;  %v182_v34 = vmax.f32 %v155_v31, %v178_v32 }
  0xb3   :  { %v203_v35 = vpack.c.bf16 %v201_v33, %v201_v33  ;;  %v188_v36 = vadd.f32 %v272_v20, %v182_v34 }
  0xb5   :  { %206 = vst.msk [vmem:[%s358_s5] sm:$0xf] %vm205_vm2, %v203_v35  ;;  %v190_v37 = vmax.f32 %v188_v36, 0.0 }
  0xb7   :  { %v196_v38 = vmul.f32 %v273_v25, %v190_v37 }
  0xb9   :  { %v202_v39 = vadd.f32 %v274_v27, %v196_v38 }
  0xbb   :  { %v204_v40 = vpack.c.bf16 %v202_v39, %v202_v39 }
  0xbd   :  { %207 = vst.msk [vmem:[%s358_s5 + $0x4] sm:$0xf] %vm205_vm2, %v204_v40 }

// kernel: cnn_forward.5
= control target key start
LH: loop header
LB: loop body
LE: loop exit
PB: predicated region body
PF: predicated region fallthrough
CT: control target
= control target key end

     0   :  { %s255_s0 = inlined_call_operand.vmem [shape: bf16[2,64], index: 0, kind: input, shape index: {}]   ;;  %s256_s1 = inlined_call_operand.vmem [shape: bf16[64,32], index: 1, kind: input, shape index: {}]   ;;  %s257_s2 = inlined_call_operand.vmem [shape: f32[1,32], index: 2, kind: input, shape index: {}]   ;;  %s258_s3 = inlined_call_operand.vmem [shape: bf16[32,4], index: 3, kind: input, shape index: {}]   ;;  %s259_s4 = inlined_call_operand.vmem [shape: f32[1,4], index: 4, kind: input, shape index: {}]   ;;  %s260_s5 = inlined_call_operand.hbm [shape: f32[2,4], index: 5, kind: output, shape index: {}]  }
   0x1   :  { %v162_v0 = vld [vmem:[%s256_s1 + $0x18] sm:$0xff]  ;;  %v161_v1 = vld [vmem:[%s256_s1 + $0x10] sm:$0xff] }
   0x2   :  { %67 = vmatpush.bf16.msra.mxu0 %v162_v0 }
   0x3   :  { %10 = vsyncpa [#allocation3], 0  ;;  %v160_v2 = vld [vmem:[%s256_s1 + $0x8] sm:$0xff]  ;;  %v159_v3 = vld [vmem:[%s256_s1] sm:$0xff]  ;;  %vm59_vm0 = vcmask 523264   ;;  %vm98_vm1 = vcmask 261120  }
   0x4   :  { %v22_v4 = vld [vmem:[%s255_s0] sm:$0x1]  ;;  %v164_v5 = vld [vmem:[%s258_s3 + $0x8] sm:$0xff]  ;;  %s194_s9 = smov [#allocation2]   ;;  %s124_s12 = sshll.u32 %s260_s5, 4  ;;  %vm115_vm2 = vcmask 25600   ;;  %s125_s12 = int_to_ptr.hbm [resolvable:$true] %s124_s12 }
   0x5   :  { %108 = vmatpush.bf16.msra.mxu1 %v164_v5  ;;  %v163_v6 = vld [vmem:[%s258_s3] sm:$0xff]  ;;  %s122_s10 = sshll.u32 %s194_s9, 4  ;;  %s123_s10 = int_to_ptr.vmem [resolvable:$true] %s122_s10 }
   0x6   :  { %68 = vmatpush.bf16.msra.mxu0 %v161_v1  ;;  %v166_v7 = vld [vmem:[%s257_s2] ss:$0 sm:$0xff] }
   0x7   :  { %v167_v13 = vld [vmem:[%s259_s4] ss:$0 sm:$0xff] }
   0x9   :  { %109 = vmatpush.bf16.msra.mxu1 %v163_v6 }
   0xa   :  { %69 = vmatpush.bf16.msra.mxu0 %v160_v2 }
   0xe   :  { %70 = vmatpush.bf16.msra.mxu0 %v159_v3 }
  0x11   :  { %149 = vmatmul.msk.bf16.vlgmr.msra.gmra.mxu0 %vm59_vm0, %v22_v4 }
  0x8e   :  { %v72_v8 = vpop.f32.mrf.mxu0 }
  0x8f   :  { %v73_v9 = vadd.f32 %v166_v7, %v72_v8 }
  0x91   :  { %v76_v10 = vmax.f32 %v73_v9, 0.0 }
  0x93   :  { %v77_v11 = vpack.c.bf16 %v76_v10, %v76_v10 }
  0x95   :  { %158 = vmatmul.msk.bf16.vlgmr.msra.gmra.mxu1 %vm98_vm1, %v77_v11 }
  0x96   :  { %v74_v12 = vpop.f32.mrf.mxu0 }
 0x112   :  { %v111_v14 = vpop.f32.mrf.mxu1 }
 0x113   :  { %v112_v15 = vadd.f32 %v167_v13, %v111_v14 }
 0x115   :  { %116 = vst.msk [vmem:[#allocation2] sm:$0x3] %vm115_vm2, %v112_v15 }
 0x116   :  { %127 = dma.vmem_to_hbm [thread:$0]  %s123_s10, 32, %s125_s12, [#allocation3]  }
 0x11a   :  { %v113_v16 = vpop.f32.mrf.mxu1 }
 0x11b   :  { %192 = dma.done.wait [#allocation3], 32  }
 0x11c   :  { %193 = vsyncadd [#allocation3], 4294967264 }
 0x11d   :  { %132 = vsyncpa [#allocation3], 1 }

</bundles_post_ra>
